<compile_context>
chip_gen: v7x
topology: tpu7x:2x2x1
jax: 0.10.0
libtpu: 0.0.40
codegen_flags: <defaults>
</compile_context>

<pallas_src>
import functools

import jax
import jax.numpy as jnp
from jax.experimental import pallas as pl
from jax.experimental.pallas import tpu as pltpu


def _round_up(x, m):
    return (x + m - 1) // m * m


def _pc_fused_kernel(xd_ref, xr_ref, w_ref, b_ref, o_ref, xc_ref, q_ref, *,
                     n_dirs, c_in, hw_valid, hw_pad):
    """Fused 1x1-conv + Gram-Schmidt for one batch element.

    xd_ref, xr_ref : [C,  HWp]            distorted / restored activations
    w_ref          : [n_dirs, c_per, 2C]  folded conv weight (slab-major)
    b_ref          : [n_dirs, c_per, 1]   folded bias
    o_ref          : [n_dirs, c_per, HWp] orthogonalized (un-normalized) output
    xc_ref         : [2C, HWp]            VMEM staging for concat(xd, xr)
    q_ref          : [n_dirs-1, c_per, HWp] normalized directions (scratch)
    """
    # Stage concat([xd, xr], axis=0) once in VMEM: one K=2C MXU dot per slab
    # instead of two K=C dots (half the MXU pushes/pops), without an HBM
    # concat copy in the wrapper. The offset-C store is sub-tile but runs once.
    xc_ref[pl.ds(0, c_in), :] = xd_ref[...]
    xc_ref[pl.ds(c_in, c_in), :] = xr_ref[...]

    # Lane-padding mask (only materialized when HW was padded up to 128k).
    if hw_valid < hw_pad:
        lane = jax.lax.broadcasted_iota(jnp.int32, (1, hw_pad), 1)
        pad_mask = lane < hw_valid
    else:
        pad_mask = None

    for i in range(n_dirs):
        # Per-slab conv: [c_per, 2C] @ [2C, HWp] -> [c_per, HWp], f32 accum.
        # Slab i's dot is independent of GS on earlier slabs, so the scheduler
        # overlaps MXU (vex slot) with GS's VPU/XLU/EUP work.
        w = jnp.dot(w_ref[i], xc_ref[...],
                    preferred_element_type=jnp.float32) + b_ref[i]
        if pad_mask is not None:
            w = jnp.where(pad_mask, w, 0.0)  # keep GS reductions exact

        # Modified Gram-Schmidt against previously normalized slabs (same
        # sequential ordering as the PyTorch reference).
        for j in range(i):
            q = q_ref[j]
            d = jnp.sum(w * q, axis=(0, 1), keepdims=True)   # scalar dot
            w = w - q * d

        o_ref[i] = w                                          # single store/slab
        if i + 1 < n_dirs:                                    # last q unused
            ssq = jnp.sum(w * w, axis=(0, 1), keepdims=True)
            q_ref[i] = w * jax.lax.rsqrt(ssq)                 # EUP rsqrt


def _vmem_limit_bytes(C, n_dirs, c_per, hw_pad, x_itemsize):
    """Conservative VMEM footprint (double-buffered blocks + scratch)."""
    def buf(rows, cols, item):
        sub = max(8, 32 // item)                      # sublane tile per dtype
        return _round_up(rows, sub) * _round_up(cols, 128) * item

    est = 0
    est += 2 * 2 * buf(C, hw_pad, x_itemsize)         # xd, xr inputs
    est += 2 * n_dirs * buf(c_per, 2 * C, x_itemsize)  # weight
    est += 2 * n_dirs * buf(c_per, 1, 4)              # bias
    est += 2 * n_dirs * buf(c_per, hw_pad, 4)         # output block
    est += buf(2 * C, hw_pad, x_itemsize)             # xc staging scratch
    est += max(n_dirs - 1, 1) * buf(c_per, hw_pad, 4)  # q scratch
    return min(est + (4 << 20), 128 << 20)


def pc_wrapper_forward(x_distorted, x_restored, weight, bias, *,
                       n_dirs, offset=None, scale=None):
    """PCWrapper.forward with pre_net=None, mask=None, pad_base_size=None.

    weight: [Cout, 2C]  (PyTorch Conv2d(2C->Cout, k=1) weight squeezed)
    bias  : [Cout]
    offset/scale: scalars (or None).
    Returns [B, n_dirs, Cout // n_dirs, H, W] float32.
    """
    B, C, H, W = x_distorted.shape
    cout = weight.shape[0]
    assert weight.shape[1] == 2 * C
    assert cout % n_dirs == 0
    c_per = cout // n_dirs
    hw = H * W
    hw_pad = _round_up(hw, 128)            # lane-dense output stores
    x_dtype = x_distorted.dtype

    # Fold (x - offset)/scale and the trailing /scale into weight/bias:
    #   conv((x - off)/s)/s  ==  x @ (W/s^2) + (b/s - off/s^2 * rowsum(W))
    # jnp ops so traced scalar offset/scale also work.
    w32 = weight.astype(jnp.float32)
    inv_s = (1.0 / scale) if scale is not None else 1.0
    w_eff = w32 * (inv_s * inv_s)
    b_eff = bias.astype(jnp.float32) * inv_s
    if offset is not None:
        b_eff = b_eff - (offset * inv_s * inv_s) * jnp.sum(w32, axis=1)

    # Slab-major layouts so in-kernel slab views are leading-axis indexed
    # (always tile-aligned regardless of c_per). Weight cast to the activation
    # dtype so the MXU runs its native fast path; bias stays f32 (post-accum).
    w_k = w_eff.reshape(n_dirs, c_per, 2 * C).astype(x_dtype)
    b_k = b_eff.reshape(n_dirs, c_per, 1)

    # Free trailing-dim merge; keep native dtype (no f32 upcast of activations).
    xd = x_distorted.reshape(B, C, hw)
    xr = x_restored.reshape(B, C, hw)
    if hw_pad != hw:
        xd = jnp.pad(xd, ((0, 0), (0, 0), (0, hw_pad - hw)))
        xr = jnp.pad(xr, ((0, 0), (0, 0), (0, hw_pad - hw)))

    kernel = functools.partial(_pc_fused_kernel, n_dirs=n_dirs, c_in=C,
                               hw_valid=hw, hw_pad=hw_pad)
    vmem_bytes = _vmem_limit_bytes(C, n_dirs, c_per, hw_pad,
                                   jnp.dtype(x_dtype).itemsize)

    out = pl.pallas_call(
        kernel,
        out_shape=jax.ShapeDtypeStruct((B, n_dirs, c_per, hw_pad), jnp.float32),
        grid_spec=pltpu.PrefetchScalarGridSpec(
            num_scalar_prefetch=0,
            grid=(B,),
            in_specs=[
                pl.BlockSpec((None, C, hw_pad), lambda b: (b, 0, 0)),   # xd
                pl.BlockSpec((None, C, hw_pad), lambda b: (b, 0, 0)),   # xr
                pl.BlockSpec((n_dirs, c_per, 2 * C), lambda b: (0, 0, 0)),  # W
                pl.BlockSpec((n_dirs, c_per, 1), lambda b: (0, 0, 0)),      # b
            ],
            out_specs=pl.BlockSpec((None, n_dirs, c_per, hw_pad),
                                   lambda b: (b, 0, 0, 0)),
            scratch_shapes=[
                pltpu.VMEM((2 * C, hw_pad), x_dtype),                   # xc
                pltpu.VMEM((max(n_dirs - 1, 1), c_per, hw_pad), jnp.float32),
            ],
        ),
        compiler_params=pltpu.CompilerParams(
            dimension_semantics=("parallel",),     # batch axis -> 2 TCs on v7x
            vmem_limit_bytes=int(vmem_bytes)),
    )(xd, xr, w_k, b_k)

    if hw_pad != hw:
        out = out[..., :hw]
    # Splitting trailing dims is a free reshape: [..., HW] -> [..., H, W].
    return out.reshape(B, n_dirs, c_per, H, W)


def _reference(x_distorted, x_restored, weight, bias, *, n_dirs, offset, scale):
    """Pure-JAX replica of the PyTorch PCWrapper.forward (pre_net/mask/pad None)."""
    B, C, H, W = x_distorted.shape
    xd = (x_distorted - offset) / scale
    xr = (x_restored - offset) / scale
    x = jnp.concatenate([xd, xr], axis=1)                           # [B, 2C, H, W]
    y = jnp.einsum('oc,bchw->bohw', weight, x) + bias[None, :, None, None]
    y = y / scale
    cout = weight.shape[0]
    c_per = cout // n_dirs
    wm = y.reshape(B, n_dirs, c_per * H * W)
    outs, qs = [], []
    for i in range(n_dirs):
        w = wm[:, i, :]
        for q in qs:
            w = w - q * jnp.sum(w * q, axis=-1, keepdims=True)
        outs.append(w)
        qs.append(w / jnp.linalg.norm(w, axis=-1, keepdims=True))
    return jnp.stack(outs, axis=1).reshape(B, n_dirs, c_per, H, W)


if __name__ == "__main__":
    key = jax.random.PRNGKey(0)
    B, C, H, W = 2, 4, 16, 16
    n_dirs, c_per = 4, 4
    cout = n_dirs * c_per
    offset, scale = 0.5, 2.0

    k1, k2, k3, k4 = jax.random.split(key, 4)
    x_distorted = jax.random.normal(k1, (B, C, H, W), jnp.float32)
    x_restored = jax.random.normal(k2, (B, C, H, W), jnp.float32)
    # Synthetic `net`: Conv2d(2C -> n_dirs*c_per, kernel_size=1); weight [Cout, Cin].
    weight = jax.random.normal(k3, (cout, 2 * C), jnp.float32) * 0.1
    bias = jax.random.normal(k4, (cout,), jnp.float32) * 0.1

    out = pc_wrapper_forward(x_distorted, x_restored, weight, bias,
                             n_dirs=n_dirs, offset=offset, scale=scale)
    out = jax.block_until_ready(out)
    assert out.shape == (B, n_dirs, c_per, H, W)
    assert out.dtype == jnp.float32

    ref = _reference(x_distorted, x_restored, weight, bias,
                     n_dirs=n_dirs, offset=offset, scale=scale)
    # Tolerance accommodates the MXU's default-precision matmul path while
    # being ~4x tighter than the previous 2e-2 (all-f32 diffs measure <1e-3).
    max_err = float(jnp.max(jnp.abs(out - ref)))
    assert max_err < 5e-3, f"max abs error {max_err}"
    print("KERNEL_OK")
</pallas_src>

<mosaic_0001>
module attributes {stable_mosaic.version = 11 : i64} {
  func.func @_pc_fused_kernel(%arg0: i32, %arg1: memref<1x4x256xf32, #tpu.memory_space<vmem>>, %arg2: memref<1x4x256xf32, #tpu.memory_space<vmem>>, %arg3: memref<4x4x8xf32, #tpu.memory_space<vmem>>, %arg4: memref<4x4x1xf32, #tpu.memory_space<vmem>>, %arg5: memref<1x4x4x256xf32, #tpu.memory_space<vmem>>, %arg6: memref<8x256xf32, #tpu.memory_space<vmem>>, %arg7: memref<3x4x256xf32, #tpu.memory_space<vmem>>) attributes {dimension_semantics = [#tpu.dimension_semantics<parallel>], iteration_bounds = array<i64: 2>, scalar_prefetch = 0 : i64, scratch_operands = 2 : i64, tpu.core_type = #tpu.core_type<tc>, window_params = [{transform_indices = @transform_0, window_bounds = array<i64: 1, 4, 256>}, {transform_indices = @transform_1, window_bounds = array<i64: 1, 4, 256>}, {pipeline_mode = #tpu.pipeline_mode<synchronous>, transform_indices = @transform_2, window_bounds = array<i64: 4, 4, 8>}, {pipeline_mode = #tpu.pipeline_mode<synchronous>, transform_indices = @transform_3, window_bounds = array<i64: 4, 4, 1>}, {transform_indices = @transform_4, window_bounds = array<i64: 1, 4, 4, 256>}]} {
    %c0 = arith.constant 0 : index
    %c0_0 = arith.constant 0 : index
    %c0_1 = arith.constant 0 : index
    %0 = vector.load %arg1[%c0, %c0_0, %c0_1] : memref<1x4x256xf32, #tpu.memory_space<vmem>>, vector<1x4x256xf32>
    %1 = vector.shape_cast %0 : vector<1x4x256xf32> to vector<4x256xf32>
    %c0_2 = arith.constant 0 : index
    %c0_3 = arith.constant 0 : index
    %2 = vector.load %arg6[%c0_2, %c0_3] : memref<8x256xf32, #tpu.memory_space<vmem>>, vector<4x256xf32>
    tpu.vector_store %arg6[%c0_2, %c0_3], %1 {strides = array<i32>} : memref<8x256xf32, #tpu.memory_space<vmem>>, vector<4x256xf32>,
    %c0_4 = arith.constant 0 : index
    %c0_5 = arith.constant 0 : index
    %c0_6 = arith.constant 0 : index
    %3 = vector.load %arg2[%c0_4, %c0_5, %c0_6] : memref<1x4x256xf32, #tpu.memory_space<vmem>>, vector<1x4x256xf32>
    %4 = vector.shape_cast %3 : vector<1x4x256xf32> to vector<4x256xf32>
    %c4 = arith.constant 4 : index
    %c0_7 = arith.constant 0 : index
    %5 = vector.load %arg6[%c4, %c0_7] : memref<8x256xf32, #tpu.memory_space<vmem>>, vector<4x256xf32>
    tpu.vector_store %arg6[%c4, %c0_7], %4 {strides = array<i32>} : memref<8x256xf32, #tpu.memory_space<vmem>>, vector<4x256xf32>,
    %c0_8 = arith.constant 0 : index
    %c0_9 = arith.constant 0 : index
    %c0_10 = arith.constant 0 : index
    %6 = vector.load %arg3[%c0_8, %c0_9, %c0_10] : memref<4x4x8xf32, #tpu.memory_space<vmem>>, vector<1x4x8xf32>
    %7 = vector.shape_cast %6 : vector<1x4x8xf32> to vector<4x8xf32>
    %c0_11 = arith.constant 0 : index
    %c0_12 = arith.constant 0 : index
    %8 = vector.load %arg6[%c0_11, %c0_12] : memref<8x256xf32, #tpu.memory_space<vmem>>, vector<8x256xf32>
    %cst = arith.constant dense<0.000000e+00> : vector<4x256xf32>
    %9 = tpu.matmul %7, %8, %cst {dimension_numbers = #tpu.dot_dimension_numbers<[1], [0], [0], [1], [0, 0, 1, 1], [], []>} : vector<4x8xf32>, vector<8x256xf32>, vector<4x256xf32> -> vector<4x256xf32>
    %c0_13 = arith.constant 0 : index
    %c0_14 = arith.constant 0 : index
    %c0_15 = arith.constant 0 : index
    %10 = vector.load %arg4[%c0_13, %c0_14, %c0_15] : memref<4x4x1xf32, #tpu.memory_space<vmem>>, vector<1x4x1xf32>
    %11 = vector.shape_cast %10 : vector<1x4x1xf32> to vector<4x1xf32>
    %12 = vector.broadcast %11 : vector<4x1xf32> to vector<4x256xf32>
    %13 = arith.addf %9, %12 : vector<4x256xf32>
    %c0_16 = arith.constant 0 : index
    %c0_17 = arith.constant 0 : index
    %c0_18 = arith.constant 0 : index
    %c0_19 = arith.constant 0 : index
    %14 = vector.load %arg5[%c0_16, %c0_17, %c0_18, %c0_19] : memref<1x4x4x256xf32, #tpu.memory_space<vmem>>, vector<1x1x4x256xf32>
    %15 = vector.shape_cast %14 : vector<1x1x4x256xf32> to vector<4x256xf32>
    %16 = vector.shape_cast %13 : vector<4x256xf32> to vector<1x1x4x256xf32>
    tpu.vector_store %arg5[%c0_16, %c0_17, %c0_18, %c0_19], %16 {strides = array<i32>} : memref<1x4x4x256xf32, #tpu.memory_space<vmem>>, vector<1x1x4x256xf32>,
    %17 = arith.mulf %13, %13 : vector<4x256xf32>
    %18 = vector.shape_cast %17 : vector<4x256xf32> to vector<1x4x256xf32>
    %cst_20 = arith.constant dense<0.000000e+00> : vector<1xf32>
    %19 = vector.multi_reduction <add>, %18, %cst_20 [1, 2] : vector<1x4x256xf32> to vector<1xf32>
    %20 = vector.shape_cast %19 : vector<1xf32> to vector<1x1x1xf32>
    %21 = vector.extract %20[0, 0, 0] : f32 from vector<1x1x1xf32>
    %22 = vector.broadcast %21 : f32 to vector<1x1xf32>
    %23 = math.rsqrt %22 : vector<1x1xf32>
    %24 = vector.broadcast %23 : vector<1x1xf32> to vector<4x256xf32>
    %25 = arith.mulf %13, %24 : vector<4x256xf32>
    %c0_21 = arith.constant 0 : index
    %c0_22 = arith.constant 0 : index
    %c0_23 = arith.constant 0 : index
    %26 = vector.load %arg7[%c0_21, %c0_22, %c0_23] : memref<3x4x256xf32, #tpu.memory_space<vmem>>, vector<1x4x256xf32>
    %27 = vector.shape_cast %26 : vector<1x4x256xf32> to vector<4x256xf32>
    %28 = vector.shape_cast %25 : vector<4x256xf32> to vector<1x4x256xf32>
    tpu.vector_store %arg7[%c0_21, %c0_22, %c0_23], %28 {strides = array<i32>} : memref<3x4x256xf32, #tpu.memory_space<vmem>>, vector<1x4x256xf32>,
    %c1 = arith.constant 1 : index
    %c0_24 = arith.constant 0 : index
    %c0_25 = arith.constant 0 : index
    %29 = vector.load %arg3[%c1, %c0_24, %c0_25] : memref<4x4x8xf32, #tpu.memory_space<vmem>>, vector<1x4x8xf32>
    %30 = vector.shape_cast %29 : vector<1x4x8xf32> to vector<4x8xf32>
    %c0_26 = arith.constant 0 : index
    %c0_27 = arith.constant 0 : index
    %31 = vector.load %arg6[%c0_26, %c0_27] : memref<8x256xf32, #tpu.memory_space<vmem>>, vector<8x256xf32>
    %cst_28 = arith.constant dense<0.000000e+00> : vector<4x256xf32>
    %32 = tpu.matmul %30, %31, %cst_28 {dimension_numbers = #tpu.dot_dimension_numbers<[1], [0], [0], [1], [0, 0, 1, 1], [], []>} : vector<4x8xf32>, vector<8x256xf32>, vector<4x256xf32> -> vector<4x256xf32>
    %c1_29 = arith.constant 1 : index
    %c0_30 = arith.constant 0 : index
    %c0_31 = arith.constant 0 : index
    %33 = vector.load %arg4[%c1_29, %c0_30, %c0_31] : memref<4x4x1xf32, #tpu.memory_space<vmem>>, vector<1x4x1xf32>
    %34 = vector.shape_cast %33 : vector<1x4x1xf32> to vector<4x1xf32>
    %35 = vector.broadcast %34 : vector<4x1xf32> to vector<4x256xf32>
    %36 = arith.addf %32, %35 : vector<4x256xf32>
    %c0_32 = arith.constant 0 : index
    %c0_33 = arith.constant 0 : index
    %c0_34 = arith.constant 0 : index
    %37 = vector.load %arg7[%c0_32, %c0_33, %c0_34] : memref<3x4x256xf32, #tpu.memory_space<vmem>>, vector<1x4x256xf32>
    %38 = vector.shape_cast %37 : vector<1x4x256xf32> to vector<4x256xf32>
    %39 = arith.mulf %36, %38 : vector<4x256xf32>
    %40 = vector.shape_cast %39 : vector<4x256xf32> to vector<1x4x256xf32>
    %cst_35 = arith.constant dense<0.000000e+00> : vector<1xf32>
    %41 = vector.multi_reduction <add>, %40, %cst_35 [1, 2] : vector<1x4x256xf32> to vector<1xf32>
    %42 = vector.shape_cast %41 : vector<1xf32> to vector<1x1x1xf32>
    %43 = vector.extract %42[0, 0, 0] : f32 from vector<1x1x1xf32>
    %44 = vector.broadcast %43 : f32 to vector<1x1xf32>
    %45 = vector.broadcast %44 : vector<1x1xf32> to vector<4x256xf32>
    %46 = arith.mulf %38, %45 : vector<4x256xf32>
    %47 = arith.subf %36, %46 : vector<4x256xf32>
    %c0_36 = arith.constant 0 : index
    %c1_37 = arith.constant 1 : index
    %c0_38 = arith.constant 0 : index
    %c0_39 = arith.constant 0 : index
    %48 = vector.load %arg5[%c0_36, %c1_37, %c0_38, %c0_39] : memref<1x4x4x256xf32, #tpu.memory_space<vmem>>, vector<1x1x4x256xf32>
    %49 = vector.shape_cast %48 : vector<1x1x4x256xf32> to vector<4x256xf32>
    %50 = vector.shape_cast %47 : vector<4x256xf32> to vector<1x1x4x256xf32>
    tpu.vector_store %arg5[%c0_36, %c1_37, %c0_38, %c0_39], %50 {strides = array<i32>} : memref<1x4x4x256xf32, #tpu.memory_space<vmem>>, vector<1x1x4x256xf32>,
    %51 = arith.mulf %47, %47 : vector<4x256xf32>
    %52 = vector.shape_cast %51 : vector<4x256xf32> to vector<1x4x256xf32>
    %cst_40 = arith.constant dense<0.000000e+00> : vector<1xf32>
    %53 = vector.multi_reduction <add>, %52, %cst_40 [1, 2] : vector<1x4x256xf32> to vector<1xf32>
    %54 = vector.shape_cast %53 : vector<1xf32> to vector<1x1x1xf32>
    %55 = vector.extract %54[0, 0, 0] : f32 from vector<1x1x1xf32>
    %56 = vector.broadcast %55 : f32 to vector<1x1xf32>
    %57 = math.rsqrt %56 : vector<1x1xf32>
    %58 = vector.broadcast %57 : vector<1x1xf32> to vector<4x256xf32>
    %59 = arith.mulf %47, %58 : vector<4x256xf32>
    %c1_41 = arith.constant 1 : index
    %c0_42 = arith.constant 0 : index
    %c0_43 = arith.constant 0 : index
    %60 = vector.load %arg7[%c1_41, %c0_42, %c0_43] : memref<3x4x256xf32, #tpu.memory_space<vmem>>, vector<1x4x256xf32>
    %61 = vector.shape_cast %60 : vector<1x4x256xf32> to vector<4x256xf32>
    %62 = vector.shape_cast %59 : vector<4x256xf32> to vector<1x4x256xf32>
    tpu.vector_store %arg7[%c1_41, %c0_42, %c0_43], %62 {strides = array<i32>} : memref<3x4x256xf32, #tpu.memory_space<vmem>>, vector<1x4x256xf32>,
    %c2 = arith.constant 2 : index
    %c0_44 = arith.constant 0 : index
    %c0_45 = arith.constant 0 : index
    %63 = vector.load %arg3[%c2, %c0_44, %c0_45] : memref<4x4x8xf32, #tpu.memory_space<vmem>>, vector<1x4x8xf32>
    %64 = vector.shape_cast %63 : vector<1x4x8xf32> to vector<4x8xf32>
    %c0_46 = arith.constant 0 : index
    %c0_47 = arith.constant 0 : index
    %65 = vector.load %arg6[%c0_46, %c0_47] : memref<8x256xf32, #tpu.memory_space<vmem>>, vector<8x256xf32>
    %cst_48 = arith.constant dense<0.000000e+00> : vector<4x256xf32>
    %66 = tpu.matmul %64, %65, %cst_48 {dimension_numbers = #tpu.dot_dimension_numbers<[1], [0], [0], [1], [0, 0, 1, 1], [], []>} : vector<4x8xf32>, vector<8x256xf32>, vector<4x256xf32> -> vector<4x256xf32>
    %c2_49 = arith.constant 2 : index
    %c0_50 = arith.constant 0 : index
    %c0_51 = arith.constant 0 : index
    %67 = vector.load %arg4[%c2_49, %c0_50, %c0_51] : memref<4x4x1xf32, #tpu.memory_space<vmem>>, vector<1x4x1xf32>
    %68 = vector.shape_cast %67 : vector<1x4x1xf32> to vector<4x1xf32>
    %69 = vector.broadcast %68 : vector<4x1xf32> to vector<4x256xf32>
    %70 = arith.addf %66, %69 : vector<4x256xf32>
    %c0_52 = arith.constant 0 : index
    %c0_53 = arith.constant 0 : index
    %c0_54 = arith.constant 0 : index
    %71 = vector.load %arg7[%c0_52, %c0_53, %c0_54] : memref<3x4x256xf32, #tpu.memory_space<vmem>>, vector<1x4x256xf32>
    %72 = vector.shape_cast %71 : vector<1x4x256xf32> to vector<4x256xf32>
    %73 = arith.mulf %70, %72 : vector<4x256xf32>
    %74 = vector.shape_cast %73 : vector<4x256xf32> to vector<1x4x256xf32>
    %cst_55 = arith.constant dense<0.000000e+00> : vector<1xf32>
    %75 = vector.multi_reduction <add>, %74, %cst_55 [1, 2] : vector<1x4x256xf32> to vector<1xf32>
    %76 = vector.shape_cast %75 : vector<1xf32> to vector<1x1x1xf32>
    %77 = vector.extract %76[0, 0, 0] : f32 from vector<1x1x1xf32>
    %78 = vector.broadcast %77 : f32 to vector<1x1xf32>
    %79 = vector.broadcast %78 : vector<1x1xf32> to vector<4x256xf32>
    %80 = arith.mulf %72, %79 : vector<4x256xf32>
    %81 = arith.subf %70, %80 : vector<4x256xf32>
    %c1_56 = arith.constant 1 : index
    %c0_57 = arith.constant 0 : index
    %c0_58 = arith.constant 0 : index
    %82 = vector.load %arg7[%c1_56, %c0_57, %c0_58] : memref<3x4x256xf32, #tpu.memory_space<vmem>>, vector<1x4x256xf32>
    %83 = vector.shape_cast %82 : vector<1x4x256xf32> to vector<4x256xf32>
    %84 = arith.mulf %81, %83 : vector<4x256xf32>
    %85 = vector.shape_cast %84 : vector<4x256xf32> to vector<1x4x256xf32>
    %cst_59 = arith.constant dense<0.000000e+00> : vector<1xf32>
    %86 = vector.multi_reduction <add>, %85, %cst_59 [1, 2] : vector<1x4x256xf32> to vector<1xf32>
    %87 = vector.shape_cast %86 : vector<1xf32> to vector<1x1x1xf32>
    %88 = vector.extract %87[0, 0, 0] : f32 from vector<1x1x1xf32>
    %89 = vector.broadcast %88 : f32 to vector<1x1xf32>
    %90 = vector.broadcast %89 : vector<1x1xf32> to vector<4x256xf32>
    %91 = arith.mulf %83, %90 : vector<4x256xf32>
    %92 = arith.subf %81, %91 : vector<4x256xf32>
    %c0_60 = arith.constant 0 : index
    %c2_61 = arith.constant 2 : index
    %c0_62 = arith.constant 0 : index
    %c0_63 = arith.constant 0 : index
    %93 = vector.load %arg5[%c0_60, %c2_61, %c0_62, %c0_63] : memref<1x4x4x256xf32, #tpu.memory_space<vmem>>, vector<1x1x4x256xf32>
    %94 = vector.shape_cast %93 : vector<1x1x4x256xf32> to vector<4x256xf32>
    %95 = vector.shape_cast %92 : vector<4x256xf32> to vector<1x1x4x256xf32>
    tpu.vector_store %arg5[%c0_60, %c2_61, %c0_62, %c0_63], %95 {strides = array<i32>} : memref<1x4x4x256xf32, #tpu.memory_space<vmem>>, vector<1x1x4x256xf32>,
    %96 = arith.mulf %92, %92 : vector<4x256xf32>
    %97 = vector.shape_cast %96 : vector<4x256xf32> to vector<1x4x256xf32>
    %cst_64 = arith.constant dense<0.000000e+00> : vector<1xf32>
    %98 = vector.multi_reduction <add>, %97, %cst_64 [1, 2] : vector<1x4x256xf32> to vector<1xf32>
    %99 = vector.shape_cast %98 : vector<1xf32> to vector<1x1x1xf32>
    %100 = vector.extract %99[0, 0, 0] : f32 from vector<1x1x1xf32>
    %101 = vector.broadcast %100 : f32 to vector<1x1xf32>
    %102 = math.rsqrt %101 : vector<1x1xf32>
    %103 = vector.broadcast %102 : vector<1x1xf32> to vector<4x256xf32>
    %104 = arith.mulf %92, %103 : vector<4x256xf32>
    %c2_65 = arith.constant 2 : index
    %c0_66 = arith.constant 0 : index
    %c0_67 = arith.constant 0 : index
    %105 = vector.load %arg7[%c2_65, %c0_66, %c0_67] : memref<3x4x256xf32, #tpu.memory_space<vmem>>, vector<1x4x256xf32>
    %106 = vector.shape_cast %105 : vector<1x4x256xf32> to vector<4x256xf32>
    %107 = vector.shape_cast %104 : vector<4x256xf32> to vector<1x4x256xf32>
    tpu.vector_store %arg7[%c2_65, %c0_66, %c0_67], %107 {strides = array<i32>} : memref<3x4x256xf32, #tpu.memory_space<vmem>>, vector<1x4x256xf32>,
    %c3 = arith.constant 3 : index
    %c0_68 = arith.constant 0 : index
    %c0_69 = arith.constant 0 : index
    %108 = vector.load %arg3[%c3, %c0_68, %c0_69] : memref<4x4x8xf32, #tpu.memory_space<vmem>>, vector<1x4x8xf32>
    %109 = vector.shape_cast %108 : vector<1x4x8xf32> to vector<4x8xf32>
    %c0_70 = arith.constant 0 : index
    %c0_71 = arith.constant 0 : index
    %110 = vector.load %arg6[%c0_70, %c0_71] : memref<8x256xf32, #tpu.memory_space<vmem>>, vector<8x256xf32>
    %cst_72 = arith.constant dense<0.000000e+00> : vector<4x256xf32>
    %111 = tpu.matmul %109, %110, %cst_72 {dimension_numbers = #tpu.dot_dimension_numbers<[1], [0], [0], [1], [0, 0, 1, 1], [], []>} : vector<4x8xf32>, vector<8x256xf32>, vector<4x256xf32> -> vector<4x256xf32>
    %c3_73 = arith.constant 3 : index
    %c0_74 = arith.constant 0 : index
    %c0_75 = arith.constant 0 : index
    %112 = vector.load %arg4[%c3_73, %c0_74, %c0_75] : memref<4x4x1xf32, #tpu.memory_space<vmem>>, vector<1x4x1xf32>
    %113 = vector.shape_cast %112 : vector<1x4x1xf32> to vector<4x1xf32>
    %114 = vector.broadcast %113 : vector<4x1xf32> to vector<4x256xf32>
    %115 = arith.addf %111, %114 : vector<4x256xf32>
    %c0_76 = arith.constant 0 : index
    %c0_77 = arith.constant 0 : index
    %c0_78 = arith.constant 0 : index
    %116 = vector.load %arg7[%c0_76, %c0_77, %c0_78] : memref<3x4x256xf32, #tpu.memory_space<vmem>>, vector<1x4x256xf32>
    %117 = vector.shape_cast %116 : vector<1x4x256xf32> to vector<4x256xf32>
    %118 = arith.mulf %115, %117 : vector<4x256xf32>
    %119 = vector.shape_cast %118 : vector<4x256xf32> to vector<1x4x256xf32>
    %cst_79 = arith.constant dense<0.000000e+00> : vector<1xf32>
    %120 = vector.multi_reduction <add>, %119, %cst_79 [1, 2] : vector<1x4x256xf32> to vector<1xf32>
    %121 = vector.shape_cast %120 : vector<1xf32> to vector<1x1x1xf32>
    %122 = vector.extract %121[0, 0, 0] : f32 from vector<1x1x1xf32>
    %123 = vector.broadcast %122 : f32 to vector<1x1xf32>
    %124 = vector.broadcast %123 : vector<1x1xf32> to vector<4x256xf32>
    %125 = arith.mulf %117, %124 : vector<4x256xf32>
    %126 = arith.subf %115, %125 : vector<4x256xf32>
    %c1_80 = arith.constant 1 : index
    %c0_81 = arith.constant 0 : index
    %c0_82 = arith.constant 0 : index
    %127 = vector.load %arg7[%c1_80, %c0_81, %c0_82] : memref<3x4x256xf32, #tpu.memory_space<vmem>>, vector<1x4x256xf32>
    %128 = vector.shape_cast %127 : vector<1x4x256xf32> to vector<4x256xf32>
    %129 = arith.mulf %126, %128 : vector<4x256xf32>
    %130 = vector.shape_cast %129 : vector<4x256xf32> to vector<1x4x256xf32>
    %cst_83 = arith.constant dense<0.000000e+00> : vector<1xf32>
    %131 = vector.multi_reduction <add>, %130, %cst_83 [1, 2] : vector<1x4x256xf32> to vector<1xf32>
    %132 = vector.shape_cast %131 : vector<1xf32> to vector<1x1x1xf32>
    %133 = vector.extract %132[0, 0, 0] : f32 from vector<1x1x1xf32>
    %134 = vector.broadcast %133 : f32 to vector<1x1xf32>
    %135 = vector.broadcast %134 : vector<1x1xf32> to vector<4x256xf32>
    %136 = arith.mulf %128, %135 : vector<4x256xf32>
    %137 = arith.subf %126, %136 : vector<4x256xf32>
    %c2_84 = arith.constant 2 : index
    %c0_85 = arith.constant 0 : index
    %c0_86 = arith.constant 0 : index
    %138 = vector.load %arg7[%c2_84, %c0_85, %c0_86] : memref<3x4x256xf32, #tpu.memory_space<vmem>>, vector<1x4x256xf32>
    %139 = vector.shape_cast %138 : vector<1x4x256xf32> to vector<4x256xf32>
    %140 = arith.mulf %137, %139 : vector<4x256xf32>
    %141 = vector.shape_cast %140 : vector<4x256xf32> to vector<1x4x256xf32>
    %cst_87 = arith.constant dense<0.000000e+00> : vector<1xf32>
    %142 = vector.multi_reduction <add>, %141, %cst_87 [1, 2] : vector<1x4x256xf32> to vector<1xf32>
    %143 = vector.shape_cast %142 : vector<1xf32> to vector<1x1x1xf32>
    %144 = vector.extract %143[0, 0, 0] : f32 from vector<1x1x1xf32>
    %145 = vector.broadcast %144 : f32 to vector<1x1xf32>
    %146 = vector.broadcast %145 : vector<1x1xf32> to vector<4x256xf32>
    %147 = arith.mulf %139, %146 : vector<4x256xf32>
    %148 = arith.subf %137, %147 : vector<4x256xf32>
    %c0_88 = arith.constant 0 : index
    %c3_89 = arith.constant 3 : index
    %c0_90 = arith.constant 0 : index
    %c0_91 = arith.constant 0 : index
    %149 = vector.load %arg5[%c0_88, %c3_89, %c0_90, %c0_91] : memref<1x4x4x256xf32, #tpu.memory_space<vmem>>, vector<1x1x4x256xf32>
    %150 = vector.shape_cast %149 : vector<1x1x4x256xf32> to vector<4x256xf32>
    %151 = vector.shape_cast %148 : vector<4x256xf32> to vector<1x1x4x256xf32>
    tpu.vector_store %arg5[%c0_88, %c3_89, %c0_90, %c0_91], %151 {strides = array<i32>} : memref<1x4x4x256xf32, #tpu.memory_space<vmem>>, vector<1x1x4x256xf32>,
    return
  }
  func.func @transform_0(%arg0: i32) -> (i32, i32, i32) {
    %c0_i32 = arith.constant 0 : i32
    %c0_i32_0 = arith.constant 0 : i32
    %c0_i32_1 = arith.constant 0 : i32
    return %arg0, %c0_i32, %c0_i32_0 : i32, i32, i32
  }
  func.func @transform_1(%arg0: i32) -> (i32, i32, i32) {
    %c0_i32 = arith.constant 0 : i32
    %c0_i32_0 = arith.constant 0 : i32
    %c0_i32_1 = arith.constant 0 : i32
    return %arg0, %c0_i32, %c0_i32_0 : i32, i32, i32
  }
  func.func @transform_2(%arg0: i32) -> (i32, i32, i32) {
    %c0_i32 = arith.constant 0 : i32
    %c0_i32_0 = arith.constant 0 : i32
    %c0_i32_1 = arith.constant 0 : i32
    %c0_i32_2 = arith.constant 0 : i32
    return %c0_i32, %c0_i32_0, %c0_i32_1 : i32, i32, i32
  }
  func.func @transform_3(%arg0: i32) -> (i32, i32, i32) {
    %c0_i32 = arith.constant 0 : i32
    %c0_i32_0 = arith.constant 0 : i32
    %c0_i32_1 = arith.constant 0 : i32
    %c0_i32_2 = arith.constant 0 : i32
    return %c0_i32, %c0_i32_0, %c0_i32_1 : i32, i32, i32
  }
  func.func @transform_4(%arg0: i32) -> (i32, i32, i32, i32) {
    %c0_i32 = arith.constant 0 : i32
    %c0_i32_0 = arith.constant 0 : i32
    %c0_i32_1 = arith.constant 0 : i32
    %c0_i32_2 = arith.constant 0 : i32
    return %arg0, %c0_i32, %c0_i32_0, %c0_i32_1 : i32, i32, i32, i32
  }
}

</mosaic_0001>

<bundles_post_ra>
// kernel: tpu_custom_call.1
= control target key start
LH: loop header
LB: loop body
LE: loop exit
PB: predicated region body
PF: predicated region fallthrough
CT: control target
= control target key end

     0   :  { %9 = vsyncpa [#allocation5], 0  ;;  %s1511_s0 = inlined_call_operand.vmem [shape: f32[2,4,256], index: 0, kind: input, shape index: {}]   ;;  %s1512_s1 = inlined_call_operand.hbm [shape: f32[2,4,256], index: 1, kind: input, shape index: {}]   ;;  %s1513_s2 = inlined_call_operand.hbm [shape: f32[4,4,8], index: 2, kind: input, shape index: {}]   ;;  %s1514_s3 = inlined_call_operand.vmem [shape: f32[4,4,1], index: 3, kind: input, shape index: {}]   ;;  %s1515_s4 = inlined_call_operand.hbm [shape: f32[2,4,4,256], index: 4, kind: output, shape index: {}]  }
   0x1   :  { %11 = vsyncpa [#allocation5 + $0x1], 0 }
   0x2   :  { %12 = vsyncpa [#allocation8], 0 }
   0x3   :  { %13 = vsyncpa [#allocation6], 0 }
   0x4   :  { %15 = vsyncpa [#allocation6 + $0x1], 0  ;;  %s1243_s15 = smov 0   ;;  %s1245_s16 = smov 0  }
   0x5   :  { %s1247_s17 = smov 0   ;;  %s1249_s18 = smov 0  }
   0x6 LB: > { %s1264_s19 = sadd.s32 4294967295, %s1207_s18   ;;  %s954_s20 = sadd.s32 4294967294, %s1207_s18   ;;  %s1207_s18 = sphi %s1249_s18, %s1535_s18   ;;  %s1203_s17 = sphi %s1247_s17, %s1534_s17   ;;  %s1199_s16 = sphi %s1245_s16, %s1533_s16   ;;  %s1195_s15 = sphi %s1243_s15, %s1532_s15  }
   0x7   : > { %p67_p0 = scmp.ne.s32.totalorder %s1199_s16, %s1195_s15  ;;  %p1516_p1 = scmp.eq.s32.totalorder %s1264_s19, 0 }
   0x8   : > { %p139_p3 = scmp.eq.s32.totalorder %s954_s20, 1  ;;  %p955_p5 = scmp.ge.s32.totalorder %s1207_s18, 1 }
   0x9   : > { %p1273_p4 = por %p1516_p1, %p67_p0  ;;  %p146_p7 = scmp.lt.s32.totalorder %s1207_s18, 3 }
   0xa   : > { %p1278_p6 = por %p139_p3, %p67_p0  ;;  %s1209_s24 = smov [#allocation7]  }
   0xb   : > { %s1519_s21 = scalar_select %p1273_p4, 1, 0 }
   0xc   : > { %s1520_s22 = scalar_select %p1278_p6, 1, 0 }
   0xd   : > { %p1283_p8 = pnand %p955_p5, %p146_p7  ;;  %s158_s25 = sshll.u32 %s1209_s24, 4  ;;  %s1287_s25 = int_to_ptr.vmem [resolvable:$true] %s158_s25 }
   0xe   : > { %s1299_s27 = sadd.s32 1, %s1207_s18   ;;  %s54_s28 = sadd.s32 1, %s1203_s17 }
   0xf   : > { %s1521_s23 = scalar_select %p1283_p8, 1, 0 }
  0x10   : > { %p1014_p9 = pneg %p1283_p8  ;;  %s51_s29 = ssub.s32 %s1207_s18, %s1299_s27 }
  0x11   : > { %s1079_s6 = scalar_lea.hbm %s1513_s2, 256 }
  0x12   : > { %p1294_p11 = pnand %p1014_p9, %p1516_p1  ;;  %p1080_p12 = scmp.ne.s32.totalorder %s1513_s2, %s1079_s6 }
  0x13   : > { %p1086_p5 = scmp.lt.u32.totalorder %s1079_s6, %s1513_s2 }
  0x14   : > { %p1081_p13 = pneg %p1294_p11 }
  0x16   : > { %p1082_p0 = pnand %p1081_p13, %p1080_p12 }
  0x18   : > { %p1083_p3 = pneg %p1082_p0 }
  0x1a   : > { %p1088_p7 = pnand %p1086_p5, %p1083_p3 }
  0x1c   : > { %1091 = shalt.err (!%p1088_p7)
}
  0x1d   : > { %s1092_s11 = scalar_lea.vmem %s1287_s25, 256  ;;  %p1100_p2 = scmp.lt.s32.totalorder %s1287_s25, %s1287_s25 }
  0x1e   : > { %p1093_p9 = scmp.ne.s32.totalorder %s1287_s25, %s1092_s11  ;;  %p1101_p6 = scmp.lt.s32.totalorder %s1092_s11, %s1092_s11 }
  0x20   : > { %p1095_p10 = pnand %p1093_p9, %p1081_p13  ;;  %p1102_p4 = por %p1101_p6, %p1100_p2 }
  0x22   : > { %p1096_p1 = pneg %p1095_p10 }
  0x24   : > { %p1103_p8 = pnand %p1102_p4, %p1096_p1 }
  0x26   : > { %1106 = shalt.err (!%p1103_p8)
}
  0x27   : > { %s1210_s12 = smov 64   ;;  %s1211_s13 = smov 4  }
  0x28   : > { %1017 = dma.hbm_to_vmem [thread:$0]  (!%p1294_p11), %s1513_s2, 256, %s1287_s25, [#allocation8], %s1210_s12, %s1210_s12, %s1211_s13  }
  0x29   : > { %p52_p2 = scmp.eq.s32.totalorder %s51_s29, 0  ;;  %p61_p1 = scmp.ne.s32.totalorder %s1203_s17, %s1199_s16 }
  0x2a   : > { %p62_p4 = scmp.eq.s32.totalorder %s1207_s18, 0  ;;  %p1027_p6 = scmp.lt.s32.totalorder %s1207_s18, 2 }
  0x2b   : > { %s1330_s24 = scalar_select %p52_p2, %s1203_s17, %s54_s28  }
  0x2c   : > { %p63_p8 = por %p62_p4, %p61_p1  ;;  %p1523_p10 = scmp.eq.s32.totalorder %s1264_s19, 1 }
  0x2d   : > { %s183_s5 = sand.u32 1, %s1203_s17   ;;  %s982_s6 = sshll.u32 %s1207_s18, 7 }
  0x2e   : > { %p1334_p12 = por %p1523_p10, %p61_p1  ;;  %s958_s7 = sshll.u32 %s183_s5, 3 }
  0x2f   : > { %s1343_s9 = scalar_lea.hbm %s1512_s1, %s982_s6  ;;  %s187_s25 = scalar_lea.vmem [#allocation4], %s958_s7 }
  0x30   : > { %s195_s28 = sshll.u32 %s187_s25, 4  ;;  %p1345_p11 = pnand %p1027_p6, %p63_p8  ;;  %s1349_s28 = int_to_ptr.vmem [resolvable:$true] %s195_s28 }
  0x31   : > { %s184_s10 = scalar_lea.sflag [#allocation5], %s183_s5  ;;  %s1107_s11 = scalar_lea.hbm %s1343_s9, 128 }
  0x32   : > { %p1108_p13 = scmp.ne.s32.totalorder %s1343_s9, %s1107_s11  ;;  %p1109_p0 = pneg %p1345_p11 }
  0x33   : > { %s1112_s14 = scalar_lea.hbm %s1512_s1, 256  ;;  %p1113_p7 = scmp.lt.u32.totalorder %s1343_s9, %s1512_s1 }
  0x34   : > { %p1110_p3 = pnand %p1109_p0, %p1108_p13  ;;  %p1114_p9 = scmp.lt.u32.totalorder %s1112_s14, %s1107_s11 }
  0x35   : > { %p1116_p1 = scmp.lt.u32.totalorder %s1107_s11, %s1343_s9 }
  0x36   : > { %p1111_p5 = pneg %p1110_p3  ;;  %p1115_p2 = por %p1114_p9, %p1113_p7 }
  0x38   : > { %p1117_p4 = por %p1116_p1, %p1115_p2 }
  0x3a   : > { %p1118_p6 = pnand %p1117_p4, %p1111_p5 }
  0x3c   : > { %1121 = shalt.err (!%p1118_p6)
}
  0x3d   : > { %s1122_s5 = scalar_lea.vmem %s1349_s28, 128  ;;  %s1212_s7 = smov [#allocation4]  }
  0x3e   : > { %p1123_p8 = scmp.ne.s32.totalorder %s1349_s28, %s1122_s5  ;;  %s1127_s26 = sshll.u32 %s1212_s7, 4  ;;  %s1128_s26 = int_to_ptr.vmem [resolvable:$false] %s1127_s26 }
  0x3f   : > { %s1129_s8 = scalar_lea.vmem %s1128_s26, 256  ;;  %p1130_p3 = scmp.lt.s32.totalorder %s1349_s28, %s1128_s26 }
  0x40   : > { %p1125_p10 = pnand %p1123_p8, %p1109_p0  ;;  %p1131_p7 = scmp.lt.s32.totalorder %s1129_s8, %s1122_s5 }
  0x42   : > { %p1126_p13 = pneg %p1125_p10  ;;  %p1132_p9 = por %p1131_p7, %p1130_p3 }
  0x44   : > { %p1133_p2 = pnand %p1132_p9, %p1126_p13 }
  0x46   : > { %1136 = shalt.err (!%p1133_p2)
}
  0x47   : > { %1021 = dma.hbm_to_vmem [thread:$0]  (!%p1345_p11), %s1343_s9, 128, %s1349_s28, %s184_s10  }
  0x48   : > { %p1526_p5 = scmp.ne.s32.totalorder %s1521_s23, 0 }
  0x49   : > { %s1379_s25 = sand.u32 (!%p1526_p5), 1, %s1199_s16   ;;  %p1527_p0 = scmp.ne.s32.totalorder (!%p1526_p5), %s1519_s21, 0 }
  0x4a   : > { %204 = sbr.rel (%p1526_p5) target bundleno = 1867 (0x74b), region = 36  ;;  %s962_s11 = sshll.u32 (!%p1526_p5), %s1379_s25, 3 }
  0x4b   : > { %s207_s12 = scalar_lea.sflag (!%p1526_p5), [#allocation5], %s1379_s25  ;;  %s210_s13 = scalar_lea.vmem (!%p1526_p5), [#allocation4], %s962_s11 }
  0x51   : > { %1182 = dma.done.wait (%p1527_p0), %s207_s12, 128  }
  0x52   : > { %1184 = vsyncadd (%p1527_p0), %s207_s12, 4294967168  ;;  %p1528_p1 = scmp.eq.s32.totalorder %s1264_s19, 0 }
  0x54   : > { %1186 = dma.done.wait (%p1528_p1), [#allocation8], 256   ;;  %p1529_p11 = pmov %p1528_p1 }
  0x55   : > { %p244_p4 = scmp.lt.s32.totalorder %s1264_s19, 1  ;;  %v1213_v0 = vmov 0.0   ;;  %v1214_v1 = vmov 0   ;;  %v255_v3 = vld [vmem:[%s210_s13] sm:$0xff]  ;;  %v264_v6 = vld [vmem:[%s1514_s3] sm:$0xf] }
  0x56   : > { %1188 = vsyncadd (%p1529_p11), [#allocation8], 4294967040  ;;  %338 = vmatprep.mubr.f32.mxu0 %v1213_v0  ;;  %1069 = vset.pattern.permute.xlu0 %v1214_v1  ;;  %v257_v5 = vcombine.low %v255_v3, %v255_v3  ;;  %260 = vst [vmem:[#allocation2 + $0x8] sm:$0xf0] %v255_v3  ;;  %v261_v9 = vld [vmem:[#allocation7] sm:$0xf] }
  0x57   : > { %s245_s23 = scalar_select %p244_p4, %s1264_s19, 1  ;;  %452 = vmatprep.mubr.f32.mxu1 %v1213_v0  ;;  %1070 = vset.pattern.permute.xlu1 %v1214_v1  ;;  %vm270_vm0 = vcmask 64512   ;;  %v515_v10 = vld [vmem:[#allocation7 + $0x8] sm:$0xf]  ;;  %v375_v11 = vld [vmem:[#allocation7 + $0x4] sm:$0xf] }
  0x58   : > { %267 = vperm.xlu0 %1069, %v264_v6   ;;  %259 = vst [vmem:[#allocation2] sm:$0xf0] %v257_v5  ;;  %v968_v12 = vld [vmem:[%s1514_s3 + $0x4] sm:$0xf]  ;;  %s964_s5 = sshll.u32 %s1379_s25, 5  ;;  %vm352_vm1 = vcmask 1043456  }
  0x59   : > { %s983_s9 = sshll.u32 %s245_s23, 3  ;;  %382 = vperm.xlu1 %1070, %v968_v12   ;;  %s1407_s7 = scalar_lea.vmem [#allocation9], %s964_s5  ;;  %v971_v25 = vld [vmem:[%s1514_s3 + $0x8] sm:$0xf]  ;;  %v680_v12 = vld [vmem:[#allocation7 + $0xc] sm:$0xf] }
  0x5a   : > { %s248_s29 = scalar_lea.vmem %s1511_s0, %s983_s9  ;;  %s859_s6 = sshll.u32 %s1407_s7, 4  ;;  %s1461_s6 = int_to_ptr.vmem [resolvable:$true] %s859_s6 }
  0x5b   : > { %v249_v2 = vld [vmem:[%s248_s29] sm:$0xff]  ;;  %s984_s5 = sshll.u32 %s1264_s19, 9  ;;  %s1215_s19 = smov [#allocation9]  }
  0x5c   : > { %v251_v4 = vcombine.high %v249_v2, %v249_v2  ;;  %253 = vst [vmem:[#allocation2] sm:$0xf] %v249_v2 }
  0x5e   : > { %254 = vst [vmem:[#allocation2 + $0x8] sm:$0xf] %v251_v4 }
  0x63   : > { %v262_v8 = vld [vmem:[#allocation2] sm:$0xff] }
  0x65   : > { %v263_v7 = vld [vmem:[#allocation2 + $0x8] sm:$0xff] }
  0x66   : > { %274 = vmatprep.subr.mxu0 %v263_v7  ;;  %388 = vmatprep.subr.mxu1 %v263_v7 }
  0x67   : > { %275 = vmatpush1.msra.mxu0 %v262_v8  ;;  %389 = vmatpush1.msra.mxu1 %v262_v8 }
  0x68   : > { %967 = vmatmul.mubr.msk.f32.vlgmr.msra.gmra.mrb[0].mxu0 %vm270_vm0, %v261_v9  ;;  %528 = vmatprep.subr.mxu0 %v263_v7 }
  0x69   : > { %529 = vmatpush1.msra.mxu0 %v262_v8  ;;  %592 = vmatprep.mubr.f32.mxu0 %v1213_v0 }
  0x6a   : > { %693 = vmatprep.subr.mxu1 %v263_v7  ;;  %969 = vmatmul.mubr.msk.f32.vlgmr.msra.gmra.mrb[0].mxu1 %vm270_vm0, %v375_v11 }
  0x6b   : > { %694 = vmatpush1.msra.mxu1 %v262_v8  ;;  %757 = vmatprep.mubr.f32.mxu1 %v1213_v0 }
  0x6c   : > { %972 = vmatmul.mubr.msk.f32.vlgmr.msra.gmra.mrb[2].mxu0 %vm270_vm0, %v515_v10 }
  0x6e   : > { %975 = vmatmul.mubr.msk.f32.vlgmr.msra.gmra.mrb[2].mxu1 %vm270_vm0, %v680_v12 }
  0xd7   : > { %v268_v13 = vpop.permute.xlu0 %267 }
  0xd8   : > { %v383_v37 = vpop.permute.xlu1 %382 }
 0x13b   : > { %v340_v14 = vpop.f32.mrb[0].mxu0 }
 0x13c   : > { %v341_v15 = vadd.f32 %v340_v14, %v268_v13  ;;  %v342_v16 = vpop.f32.mrb[1].mxu0 }
 0x13d   : > { %v343_v17 = vadd.f32 %v342_v16, %v268_v13  ;;  %v454_v27 = vpop.f32.mrb[0].mxu1 }
 0x13e   : > { %v350_v18 = vmul.f32 %v341_v15, %v341_v15  ;;  %v456_v28 = vpop.f32.mrb[1].mxu1  ;;  %v455_v41 = vadd.f32 %v454_v27, %v383_v37 }
 0x13f   : > { %v347_v19 = vcombine.low %v341_v15, %v343_v17  ;;  %v351_v20 = vmul.f32 %v343_v17, %v343_v17  ;;  %v594_v24 = vpop.f32.mrb[2].mxu0  ;;  %v457_v42 = vadd.f32 %v456_v28, %v383_v37 }
 0x140   : > { %v353_v21 = vsel %vm352_vm1, %v350_v18, 0.0  ;;  %v596_v26 = vpop.f32.mrb[3].mxu0 }
 0x141   : > { %349 = vst [vmem:[%s1407_s7] sm:$0xff] %v347_v19  ;;  %v354_v22 = vsel %vm352_vm1, %v351_v20, 0.0 }
 0x142   : > { %v355_v23 = vadd.f32 %v354_v22, %v353_v21 }
 0x144   : > { %356 = vadd.xlane.f32.xlu0 %v355_v23 }
 0x15a   : > { %522 = vperm.xlu0 %1069, %v971_v25  }
 0x1d1   : > { %v357_v29 = vpop.xlane.xlu0 %356 }
 0x1d2   : > { %v358_v30 = vrot.slane %v357_v29, 4 }
 0x1d4   : > { %v359_v31 = vadd.f32 %v358_v30, %v357_v29 }
 0x1d6   : > { %v360_v32 = vrot.slane %v359_v31, 2 }
 0x1d8   : > { %v361_v33 = vadd.f32 %v360_v32, %v359_v31 }
 0x1d9   : > { %v523_v59 = vpop.permute.xlu0 %522 }
 0x1da   : > { %v362_v34 = vrot.slane %v361_v33, 1  ;;  %v595_v62 = vadd.f32 %v594_v24, %v523_v59  ;;  %v597_v63 = vadd.f32 %v596_v26, %v523_v59 }
 0x1dc   : > { %v363_v35 = vadd.f32 %v362_v34, %v361_v33 }
 0x1de   : > { %988 = vpush %v363_v35 }
 0x20f   : > { %s989_s11 = spop %988 }
 0x210   : > { %v365_v36 = vstv %s989_s11  ;;  %s1466_s11 = scalar_lea.hbm %s1515_s4, %s984_s5 }
 0x211   : > { %1073 = vrsqrt.f32 %v365_v36 }
 0x21b   : > { %v1074_v38 = vpop.eup %1073 }
 0x21c   : > { %v367_v39 = vmul.f32 %v1074_v38, %v341_v15  ;;  %v368_v40 = vmul.f32 %v1074_v38, %v343_v17 }
 0x21e   : > { %v1414_v43 = vcombine.low %v367_v39, %v368_v40  ;;  %v1416_v44 = vcombine.low %v368_v40, %v368_v40 }
 0x220   : > { %v463_v45 = vmul.f32 %v455_v41, %v1414_v43  ;;  %v464_v46 = vmul.f32 %v1416_v44, %v457_v42  ;;  %v603_v4 = vmul.f32 %v595_v62, %v1414_v43  ;;  %v604_v5 = vmul.f32 %v1416_v44, %v597_v63 }
 0x222   : > { %v465_v47 = vsel %vm352_vm1, %v463_v45, 0.0  ;;  %v466_v48 = vsel %vm352_vm1, %v464_v46, 0.0  ;;  %v605_v9 = vsel %vm352_vm1, %v603_v4, 0.0  ;;  %v606_v10 = vsel %vm352_vm1, %v604_v5, 0.0  ;;  %v974_v45 = vld [vmem:[%s1514_s3 + $0xc] sm:$0xf] }
 0x223   : > { %v467_v49 = vadd.f32 %v466_v48, %v465_v47  ;;  %v607_v11 = vadd.f32 %v606_v10, %v605_v9  ;;  %v759_v46 = vpop.f32.mrb[2].mxu1 }
 0x224   : > { %v761_v47 = vpop.f32.mrb[3].mxu1 }
 0x225   : > { %468 = vadd.xlane.f32.xlu1 %v467_v49 }
 0x2b2   : > { %v469_v50 = vpop.xlane.xlu1 %468 }
 0x2b3   : > { %v470_v51 = vrot.slane %v469_v50, 4 }
 0x2b5   : > { %v471_v52 = vadd.f32 %v470_v51, %v469_v50 }
 0x2b7   : > { %v472_v53 = vrot.slane %v471_v52, 2 }
 0x2b9   : > { %v473_v54 = vadd.f32 %v472_v53, %v471_v52 }
 0x2bb   : > { %v474_v55 = vrot.slane %v473_v54, 1 }
 0x2bd   : > { %v475_v56 = vadd.f32 %v474_v55, %v473_v54 }
 0x2bf   : > { %990 = vpush %v475_v56 }
 0x2f0   : > { %s991_s12 = spop %990 }
 0x2f1   : > { %v477_v57 = vstv %s991_s12  ;;  %s846_s12 = scalar_lea.sflag [#allocation6], %s1379_s25 }
 0x2f2   : > { %v478_v58 = vmul.f32 %v477_v57, %v1414_v43 }
 0x2f4   : > { %v480_v60 = vcombine.high %v478_v58, %v478_v58  ;;  %v482_v61 = vsub.f32 %v455_v41, %v478_v58 }
 0x2f6   : > { %v483_v0 = vsub.f32 %v457_v42, %v480_v60  ;;  %v490_v1 = vmul.f32 %v482_v61, %v482_v61 }
 0x2f8   : > { %v486_v2 = vcombine.low %v482_v61, %v483_v0  ;;  %v491_v3 = vmul.f32 %v483_v0, %v483_v0  ;;  %v492_v6 = vsel %vm352_vm1, %v490_v1, 0.0 }
 0x2fa   : > { %970 = vst [vmem:[%s1407_s7 + $0x8] sm:$0xff] %v486_v2  ;;  %v493_v7 = vsel %vm352_vm1, %v491_v3, 0.0 }
 0x2fb   : > { %v494_v8 = vadd.f32 %v493_v7, %v492_v6 }
 0x2fd   : > { %495 = vadd.xlane.f32.xlu1 %v494_v8 }
 0x301   : > { %608 = vadd.xlane.f32.xlu1 %v607_v11 }
 0x38a   : > { %v496_v13 = vpop.xlane.xlu1 %495 }
 0x38b   : > { %v497_v14 = vrot.slane %v496_v13, 4 }
 0x38d   : > { %v498_v15 = vadd.f32 %v497_v14, %v496_v13 }
 0x38e   : > { %v609_v16 = vpop.xlane.xlu1 %608 }
 0x38f   : > { %v499_v17 = vrot.slane %v498_v15, 2  ;;  %v610_v18 = vrot.slane %v609_v16, 4 }
 0x391   : > { %v611_v19 = vadd.f32 %v610_v18, %v609_v16  ;;  %v500_v20 = vadd.f32 %v499_v17, %v498_v15 }
 0x393   : > { %v612_v21 = vrot.slane %v611_v19, 2  ;;  %v501_v22 = vrot.slane %v500_v20, 1 }
 0x395   : > { %v502_v23 = vadd.f32 %v501_v22, %v500_v20  ;;  %v613_v24 = vadd.f32 %v612_v21, %v611_v19 }
 0x397   : > { %992 = vpush %v502_v23  ;;  %v614_v25 = vrot.slane %v613_v24, 1 }
 0x399   : > { %v615_v26 = vadd.f32 %v614_v25, %v613_v24 }
 0x39b   : > { %994 = vpush %v615_v26 }
 0x3c8   : > { %s993_s13 = spop %992 }
 0x3c9   : > { %v504_v27 = vstv %s993_s13  ;;  %s1137_s13 = scalar_lea.vmem %s1461_s6, 512 }
 0x3ca   : > { %1075 = vrsqrt.f32 %v504_v27  ;;  %p1138_p6 = scmp.ne.s32.totalorder %s1461_s6, %s1137_s13 }
 0x3cc   : > { %s995_s23 = spop %994  ;;  %p1139_p8 = pnand %p1138_p6, %p1334_p12 }
 0x3cd   : > { %v617_v28 = vstv %s995_s23  ;;  %s1141_s23 = sshll.u32 %s1215_s19, 4  ;;  %s1142_s23 = int_to_ptr.vmem [resolvable:$false] %s1141_s23 }
 0x3ce   : > { %v618_v29 = vmul.f32 %v617_v28, %v1414_v43  ;;  %p1140_p10 = pneg %p1139_p8  ;;  %s1143_s9 = scalar_lea.vmem %s1142_s23, 1024 }
 0x3cf   : > { %p1144_p13 = scmp.lt.s32.totalorder %s1461_s6, %s1142_s23  ;;  %p1145_p3 = scmp.lt.s32.totalorder %s1143_s9, %s1137_s13 }
 0x3d0   : > { %v620_v30 = vcombine.high %v618_v29, %v618_v29  ;;  %v622_v34 = vsub.f32 %v595_v62, %v618_v29 }
 0x3d1   : > { %p1146_p7 = por %p1145_p3, %p1144_p13 }
 0x3d2   : > { %v623_v35 = vsub.f32 %v597_v63, %v620_v30 }
 0x3d3   : > { %p1147_p9 = pnand %p1146_p7, %p1140_p10 }
 0x3d4   : > { %v1076_v31 = vpop.eup %1075 }
 0x3d5   : > { %v506_v32 = vmul.f32 %v1076_v31, %v482_v61  ;;  %v507_v33 = vmul.f32 %v1076_v31, %v483_v0 }
 0x3d7   : > { %v1432_v36 = vcombine.low %v506_v32, %v507_v33  ;;  %v1434_v37 = vcombine.low %v507_v33, %v507_v33 }
 0x3d9   : > { %v628_v38 = vmul.f32 %v622_v34, %v1432_v36  ;;  %v629_v39 = vmul.f32 %v1434_v37, %v623_v35 }
 0x3db   : > { %v630_v40 = vsel %vm352_vm1, %v628_v38, 0.0  ;;  %v631_v41 = vsel %vm352_vm1, %v629_v39, 0.0 }
 0x3dc   : > { %v632_v42 = vadd.f32 %v631_v41, %v630_v40 }
 0x3de   : > { %633 = vadd.xlane.f32.xlu1 %v632_v42 }
 0x3ef   : > { %687 = vperm.xlu1 %1070, %v974_v45  }
 0x46b   : > { %v634_v48 = vpop.xlane.xlu1 %633 }
 0x46c   : > { %v635_v49 = vrot.slane %v634_v48, 4 }
 0x46e   : > { %v636_v50 = vadd.f32 %v635_v49, %v634_v48 }
 0x46f   : > { %v688_v51 = vpop.permute.xlu1 %687 }
 0x470   : > { %v637_v52 = vrot.slane %v636_v50, 2  ;;  %v760_v53 = vadd.f32 %v759_v46, %v688_v51  ;;  %v762_v54 = vadd.f32 %v761_v47, %v688_v51 }
 0x472   : > { %v768_v55 = vmul.f32 %v760_v53, %v1414_v43  ;;  %v769_v56 = vmul.f32 %v1416_v44, %v762_v54  ;;  %v638_v57 = vadd.f32 %v637_v52, %v636_v50 }
 0x474   : > { %v770_v58 = vsel %vm352_vm1, %v768_v55, 0.0  ;;  %v771_v59 = vsel %vm352_vm1, %v769_v56, 0.0  ;;  %v639_v60 = vrot.slane %v638_v57, 1 }
 0x475   : > { %v772_v61 = vadd.f32 %v771_v59, %v770_v58 }
 0x476   : > { %v640_v62 = vadd.f32 %v639_v60, %v638_v57 }
 0x477   : > { %773 = vadd.xlane.f32.xlu1 %v772_v61 }
 0x478   : > { %996 = vpush %v640_v62 }
 0x4a9   : > { %s997_s21 = spop %996 }
 0x4aa   : > { %v642_v63 = vstv %s997_s21 }
 0x4ab   : > { %v643_v0 = vmul.f32 %v642_v63, %v1432_v36 }
 0x4ad   : > { %v645_v1 = vcombine.high %v643_v0, %v643_v0  ;;  %v647_v2 = vsub.f32 %v622_v34, %v643_v0 }
 0x4af   : > { %v648_v3 = vsub.f32 %v623_v35, %v645_v1  ;;  %v655_v4 = vmul.f32 %v647_v2, %v647_v2 }
 0x4b1   : > { %v651_v44 = vcombine.low %v647_v2, %v648_v3  ;;  %v656_v5 = vmul.f32 %v648_v3, %v648_v3  ;;  %v657_v6 = vsel %vm352_vm1, %v655_v4, 0.0 }
 0x4b3   : > { %973 = vst [vmem:[%s1407_s7 + $0x10] sm:$0xff] %v651_v44  ;;  %v658_v7 = vsel %vm352_vm1, %v656_v5, 0.0 }
 0x4b4   : > { %v659_v8 = vadd.f32 %v658_v7, %v657_v6 }
 0x4b6   : > { %660 = vadd.xlane.f32.xlu0 %v659_v8 }
 0x504   : > { %v774_v9 = vpop.xlane.xlu1 %773 }
 0x505   : > { %v775_v10 = vrot.slane %v774_v9, 4 }
 0x507   : > { %v776_v11 = vadd.f32 %v775_v10, %v774_v9 }
 0x509   : > { %v777_v12 = vrot.slane %v776_v11, 2 }
 0x50b   : > { %v778_v16 = vadd.f32 %v777_v12, %v776_v11 }
 0x50d   : > { %v779_v19 = vrot.slane %v778_v16, 1 }
 0x50f   : > { %v780_v22 = vadd.f32 %v779_v19, %v778_v16 }
 0x543   : > { %v661_v13 = vpop.xlane.xlu0 %660 }
 0x544   : > { %v662_v14 = vrot.slane %v661_v13, 4 }
 0x546   : > { %v663_v15 = vadd.f32 %v662_v14, %v661_v13 }
 0x548   : > { %v664_v17 = vrot.slane %v663_v15, 2 }
 0x54a   : > { %v665_v18 = vadd.f32 %v664_v17, %v663_v15 }
 0x54c   : > { %v666_v20 = vrot.slane %v665_v18, 1 }
 0x54e   : > { %v667_v21 = vadd.f32 %v666_v20, %v665_v18 }
 0x550   : > { %998 = vpush %v667_v21 }
 0x551   : > { %1000 = vpush %v780_v22 }
 0x581   : > { %s999_s29 = spop %998 }
 0x582   : > { %s1001_s10 = spop %1000  ;;  %v669_v41 = vstv %s999_s29 }
 0x583   : > { %v782_v23 = vstv %s1001_s10  ;;  %1077 = vrsqrt.f32 %v669_v41 }
 0x584   : > { %v783_v24 = vmul.f32 %v782_v23, %v1414_v43 }
 0x586   : > { %v785_v25 = vcombine.high %v783_v24, %v783_v24  ;;  %v787_v26 = vsub.f32 %v760_v53, %v783_v24 }
 0x588   : > { %v788_v27 = vsub.f32 %v762_v54, %v785_v25  ;;  %v793_v28 = vmul.f32 %v787_v26, %v1432_v36 }
 0x58a   : > { %v794_v29 = vmul.f32 %v1434_v37, %v788_v27  ;;  %v795_v30 = vsel %vm352_vm1, %v793_v28, 0.0 }
 0x58c   : > { %v796_v31 = vsel %vm352_vm1, %v794_v29, 0.0 }
 0x58d   : > { %v797_v32 = vadd.f32 %v796_v31, %v795_v30  ;;  %v1078_v42 = vpop.eup %1077 }
 0x58e   : > { %v671_v45 = vmul.f32 %v1078_v42, %v647_v2  ;;  %v672_v37 = vmul.f32 %v1078_v42, %v648_v3 }
 0x58f   : > { %798 = vadd.xlane.f32.xlu0 %v797_v32 }
 0x590   : > { %v675_v50 = vcombine.low %v671_v45, %v672_v37  ;;  %v987_v52 = vcombine.low %v672_v37, %v672_v37 }
 0x61c   : > { %v799_v33 = vpop.xlane.xlu0 %798 }
 0x61d   : > { %v800_v34 = vrot.slane %v799_v33, 4 }
 0x61f   : > { %v801_v35 = vadd.f32 %v800_v34, %v799_v33 }
 0x621   : > { %v802_v38 = vrot.slane %v801_v35, 2 }
 0x623   : > { %v803_v39 = vadd.f32 %v802_v38, %v801_v35 }
 0x625   : > { %v804_v40 = vrot.slane %v803_v39, 1 }
 0x627   : > { %v805_v43 = vadd.f32 %v804_v40, %v803_v39 }
 0x629   : > { %1002 = vpush %v805_v43 }
 0x65a   : > { %s1003_s14 = spop %1002 }
 0x65b   : > { %v807_v46 = vstv %s1003_s14 }
 0x65c   : > { %v808_v47 = vmul.f32 %v807_v46, %v1432_v36 }
 0x65e   : > { %v810_v48 = vcombine.high %v808_v47, %v808_v47  ;;  %v812_v49 = vsub.f32 %v787_v26, %v808_v47 }
 0x660   : > { %v813_v51 = vsub.f32 %v788_v27, %v810_v48  ;;  %v818_v53 = vmul.f32 %v812_v49, %v675_v50 }
 0x662   : > { %v819_v54 = vmul.f32 %v987_v52, %v813_v51  ;;  %v820_v55 = vsel %vm352_vm1, %v818_v53, 0.0 }
 0x664   : > { %v821_v56 = vsel %vm352_vm1, %v819_v54, 0.0 }
 0x665   : > { %v822_v57 = vadd.f32 %v821_v56, %v820_v55 }
 0x667   : > { %823 = vadd.xlane.f32.xlu0 %v822_v57 }
 0x6f4   : > { %v824_v58 = vpop.xlane.xlu0 %823 }
 0x6f5   : > { %v825_v59 = vrot.slane %v824_v58, 4 }
 0x6f7   : > { %v826_v60 = vadd.f32 %v825_v59, %v824_v58 }
 0x6f9   : > { %v827_v61 = vrot.slane %v826_v60, 2 }
 0x6fb   : > { %v828_v36 = vadd.f32 %v827_v61, %v826_v60 }
 0x6fd   : > { %v829_v62 = vrot.slane %v828_v36, 1 }
 0x6ff   : > { %v830_v63 = vadd.f32 %v829_v62, %v828_v36 }
 0x701   : > { %1004 = vpush %v830_v63 }
 0x732   : > { %s1005_s20 = spop %1004 }
 0x733   : > { %v832_v0 = vstv %s1005_s20 }
 0x734   : > { %v833_v1 = vmul.f32 %v832_v0, %v675_v50 }
 0x736   : > { %v835_v2 = vcombine.high %v833_v1, %v833_v1  ;;  %v837_v3 = vsub.f32 %v812_v49, %v833_v1 }
 0x738   : > { %v838_v4 = vsub.f32 %v813_v51, %v835_v2 }
 0x73a   : > { %v841_v44 = vcombine.low %v837_v3, %v838_v4 }
 0x73c   : > { %976 = vst [vmem:[%s1407_s7 + $0x18] sm:$0xff] %v841_v44 }
 0x73d   : > { %1150 = shalt.err (!%p1147_p9)
}
 0x73e   : > { %s1151_s7 = scalar_lea.hbm %s1466_s11, 512  ;;  %s1155_s29 = scalar_lea.hbm %s1515_s4, 1024 }
 0x73f   : > { %p1152_p2 = scmp.ne.s32.totalorder %s1466_s11, %s1151_s7  ;;  %p1156_p1 = scmp.lt.u32.totalorder %s1466_s11, %s1515_s4 }
 0x740   : > { %p1157_p11 = scmp.lt.u32.totalorder %s1155_s29, %s1151_s7  ;;  %p1159_p6 = scmp.lt.u32.totalorder %s1151_s7, %s1466_s11 }
 0x741   : > { %p1153_p5 = pnand %p1152_p2, %p1334_p12 }
 0x742   : > { %p1158_p4 = por %p1157_p11, %p1156_p1 }
 0x743   : > { %p1154_p0 = pneg %p1153_p5 }
 0x744   : > { %p1160_p8 = por %p1159_p6, %p1158_p4 }
 0x746   : > { %p1161_p10 = pnand %p1160_p8, %p1154_p0 }
 0x748   : > { %1164 = shalt.err (!%p1161_p10)
}
 0x749   : > { %s1216_s20 = smov 128   ;;  %s1217_s5 = smov 8  }
 0x74a   : > { %1012 = dma.vmem_to_hbm [thread:$0]  (%p1334_p12), %s1461_s6, 512, %s1466_s11, %s846_s12, %s1216_s20, %s1216_s20, %s1217_s5  }
 0x74b PF: > { %s874_s26 = sand.u32 1, %s1195_s15   ;;  %p1530_p13 = scmp.ne.s32.totalorder %s1520_s22, 0 }
 0x74c   : > { %p1531_p3 = scmp.ge.s32.totalorder %s1207_s18, 2  ;;  %s875_s8 = scalar_lea.sflag [#allocation6], %s874_s26 }
 0x74e   : > { %p1023_p7 = pnand %p1531_p3, %p1530_p13 }
 0x750   : > { %1190 = dma.done.wait (!%p1023_p7), %s875_s8, 512  }
 0x751   : > { %1192 = vsyncadd (!%p1023_p7), %s875_s8, 4294966784  ;;  %p18_p9 = scmp.ge.s32.totalorder %s1299_s27, 4   ;;  %s1532_s15 = smov %s1199_s16 }
 0x752   : > { %s1533_s16 = smov %s1203_s17  ;;  %s1534_s17 = smov %s1330_s24 }
 0x753   : > { %s1535_s18 = smov %s1299_s27  ;;  %20 = sbr.rel (!%p18_p9) target bundleno = 6 (0x6), region = 99 }
 0x75a   :  { %880 = vsyncpa [#allocation5], 1 }
 0x75b   :  { %882 = vsyncpa [#allocation5 + $0x1], 1 }
 0x75c   :  { %883 = vsyncpa [#allocation8], 1 }
 0x75d   :  { %884 = vsyncpa [#allocation6], 1 }
 0x75e   :  { %886 = vsyncpa [#allocation6 + $0x1], 1 }

</bundles_post_ra>
